<compile_context>
chip_gen: v7x
topology: tpu7x:2x2x1
jax: 0.10.0
libtpu: 0.0.40
codegen_flags: <defaults>
</compile_context>

<pallas_src>
import jax
import jax.numpy as jnp
import numpy as np
from jax.experimental import pallas as pl
from jax.experimental.pallas import tpu as pltpu

NUM_ENCODING_FUNCTIONS = 6
NUM_GROUPS = 2 * NUM_ENCODING_FUNCTIONS + 1   # identity + (sin, cos) per freq = 13
ENCODER_DIM = 32
BATCH = 8

X_DIM = 3 + NUM_ENCODING_FUNCTIONS * 3 * 2    # 39
Q_DIM = 4 + NUM_ENCODING_FUNCTIONS * 4 * 2    # 52
PE_COLS = NUM_GROUPS * 7                      # 91 (padded to 128 lanes)

# ---------------- packed-parameter row layout ----------------
# f32 "narrow" buffer, width 128 (scatter matrix, masks, biases)
ROW_S        = 0     # 8 rows: phase scatter (pose dim d -> column g*7+d, scaled)
ROW_MASK_ID  = 8     # identity-group column mask
ROW_MASK_SIN = 9     # sin-group column mask
ROW_MASK_COS = 10    # cos-group column mask
ROW_MASK_X4  = 11    # layer-4 x output mask (cols 0:32)
ROW_MASK_Q4  = 12    # layer-4 q output mask (cols 32:64)
ROW_B1       = 13
ROW_B2X      = 14
ROW_B2Q      = 15
ROW_B4       = 16
NW32_ROWS    = 24    # padded to a multiple of 8

# f32 "wide" buffer, width 256 (layer-3 biases)
WROW_B3X  = 0
WROW_B3Q  = 1
WD32_ROWS = 8

# bf16 "narrow" buffer, width 128 (all offsets multiples of 16 = bf16 tile rows)
R16_W1    = 0        # 128 rows: fused layer-1 (x -> cols 0:64, q -> cols 64:128)
R16_W2X   = 128      # 64 rows : layer-2 x (dense, no K padding)
R16_W2Q   = 192      # 64 rows : layer-2 q (dense)
R16_W4    = 256      # 256 rows: fused layer-4 (x -> cols 0:32, q -> cols 32:64)
NW16_ROWS = 512

# bf16 "wide" buffer, width 256
R16_W3X   = 0        # 128 rows
R16_W3Q   = 128      # 128 rows
WD16_ROWS = 256


def _round_up(n, m):
    return ((n + m - 1) // m) * m


# ----------------------------------------------------------------------------
# Pallas kernel: positional encoding + both 4-layer MLPs, fully fused
# ----------------------------------------------------------------------------
def pose_encoder_kernel(pose_ref, nw32_ref, wd32_ref, nw16_ref, wd16_ref, out_ref):
    f32 = jnp.float32
    pose = pose_ref[...]                                    # [TB, 8] (col 7 = 0)

    # --- f32 scatter matrix, masks, biases ---------------------------------
    s_mat = nw32_ref[ROW_S:ROW_S + 8, :]                    # [8, 128]
    id_m  = nw32_ref[ROW_MASK_ID:ROW_MASK_ID + 1, :]        # [1, 128]
    sin_m = nw32_ref[ROW_MASK_SIN:ROW_MASK_SIN + 1, :]
    cos_m = nw32_ref[ROW_MASK_COS:ROW_MASK_COS + 1, :]
    m4x   = nw32_ref[ROW_MASK_X4:ROW_MASK_X4 + 1, :]
    m4q   = nw32_ref[ROW_MASK_Q4:ROW_MASK_Q4 + 1, :]
    b1    = nw32_ref[ROW_B1:ROW_B1 + 1, :]
    b2x   = nw32_ref[ROW_B2X:ROW_B2X + 1, :]
    b2q   = nw32_ref[ROW_B2Q:ROW_B2Q + 1, :]
    b4    = nw32_ref[ROW_B4:ROW_B4 + 1, :]
    b3x   = wd32_ref[WROW_B3X:WROW_B3X + 1, :]              # [1, 256]
    b3q   = wd32_ref[WROW_B3Q:WROW_B3Q + 1, :]

    # --- bf16-stored weights, upcast for f32-accumulated MXU dots ----------
    # (sin/cos, masks, biases and activations stay f32 — v5e VPU/EUP have no bf16.)
    w1  = nw16_ref[R16_W1:R16_W1 + 128, :].astype(f32)      # [128, 128]
    w2x = nw16_ref[R16_W2X:R16_W2X + 64, :].astype(f32)     # [64, 128]
    w2q = nw16_ref[R16_W2Q:R16_W2Q + 64, :].astype(f32)     # [64, 128]
    w4  = nw16_ref[R16_W4:R16_W4 + 256, :].astype(f32)      # [256, 128]
    w3x = wd16_ref[R16_W3X:R16_W3X + 128, :].astype(f32)    # [128, 256]
    w3q = wd16_ref[R16_W3Q:R16_W3Q + 128, :].astype(f32)    # [128, 256]

    # --- positional encoding on the full pose, built lane-dense ------------
    phase = jnp.dot(pose, s_mat, preferred_element_type=f32)        # [TB, 128]
    pe = id_m * phase + sin_m * jnp.sin(phase) + cos_m * jnp.cos(phase)

    relu = lambda v: jnp.maximum(v, 0.0)

    # layer 1 (fused x+q): h1 cols 0:64 = x hidden, cols 64:128 = q hidden
    h1 = relu(jnp.dot(pe, w1, preferred_element_type=f32) + b1)     # [TB, 128]
    # layer 2 per path, dense 64-row weights against lane slices of h1
    h2x = relu(jnp.dot(h1[:, 0:64], w2x, preferred_element_type=f32) + b2x)
    h2q = relu(jnp.dot(h1[:, 64:128], w2q, preferred_element_type=f32) + b2q)
    # layer 3 per path
    h3x = relu(jnp.dot(h2x, w3x, preferred_element_type=f32) + b3x)  # [TB, 256]
    h3q = relu(jnp.dot(h2q, w3q, preferred_element_type=f32) + b3q)  # [TB, 256]
    # layer 4, single de-zeroed [256,128] weight; mask out the cross terms
    out = (m4x * jnp.dot(h3x, w4, preferred_element_type=f32)
           + m4q * jnp.dot(h3q, w4, preferred_element_type=f32) + b4)
    out_ref[...] = out                                               # [TB, 128]


# ----------------------------------------------------------------------------
# Wrapper: batched grid, weight blocks fetched once and reused across steps
# ----------------------------------------------------------------------------
@jax.jit
def pose_encoder_forward(pose8, nw32, wd32, nw16, wd16):
    """pose8: [B, 8] f32 (col 7 = 0); returns [B, 64] slab (x: 0:32, q: 32:64)."""
    b = pose8.shape[0]
    if b <= 128:
        tb = _round_up(b, 8)
        b_pad = tb
    else:
        tb = 128
        b_pad = _round_up(b, tb)
    if b_pad != b:
        pose8 = jnp.pad(pose8, ((0, b_pad - b), (0, 0)))

    const_spec = lambda a: pl.BlockSpec(a.shape, lambda i: (0, 0))

    out = pl.pallas_call(
        pose_encoder_kernel,
        out_shape=jax.ShapeDtypeStruct((b_pad, 128), jnp.float32),
        grid=(b_pad // tb,),
        in_specs=[
            pl.BlockSpec((tb, 8), lambda i: (i, 0)),   # pose tile walks the grid
            const_spec(nw32),                          # parameter blocks: constant
            const_spec(wd32),                          # index -> DMA'd once, reused
            const_spec(nw16),
            const_spec(wd16),
        ],
        out_specs=pl.BlockSpec((tb, 128), lambda i: (i, 0)),
        compiler_params=pltpu.CompilerParams(
            dimension_semantics=("parallel",)),        # v7x: split batch over 2 TCs
    )(pose8, nw32, wd32, nw16, wd16)
    return out[:b, 0:2 * ENCODER_DIM]


# ----------------------------------------------------------------------------
# Deterministic parameter init (xavier_uniform for matrices, zeros for biases)
# ----------------------------------------------------------------------------
def _xavier(key, fan_in, fan_out):
    bound = np.sqrt(6.0 / (fan_in + fan_out))
    return jax.random.uniform(key, (fan_in, fan_out), jnp.float32, -bound, bound)


def make_params(key):
    dims_x = [X_DIM, 64, 128, 256, ENCODER_DIM]
    dims_q = [Q_DIM, 64, 128, 256, ENCODER_DIM]
    keys = jax.random.split(key, 8)
    params = {}
    for i in range(4):
        params[f"xw{i+1}"] = _xavier(keys[i], dims_x[i], dims_x[i + 1])
        params[f"xb{i+1}"] = jnp.zeros((1, dims_x[i + 1]), jnp.float32)
        params[f"qw{i+1}"] = _xavier(keys[4 + i], dims_q[i], dims_q[i + 1])
        params[f"qb{i+1}"] = jnp.zeros((1, dims_q[i + 1]), jnp.float32)
    return params


# ----------------------------------------------------------------------------
# Host-side one-time packing into four lane-dense buffers
# ----------------------------------------------------------------------------
def pack_params(params):
    p = {k: np.asarray(v, np.float32) for k, v in params.items()}
    nw32 = np.zeros((NW32_ROWS, 128), np.float32)
    wd32 = np.zeros((WD32_ROWS, 256), np.float32)
    nw16 = np.zeros((NW16_ROWS, 128), np.float32)
    wd16 = np.zeros((WD16_ROWS, 256), np.float32)

    # phase scatter matrix S + column masks.
    # PE column layout: c = g*7 + d; groups g: 0=identity, 1+2i=sin(2^i), 2+2i=cos(2^i)
    for g in range(NUM_GROUPS):
        scale = 1.0 if g == 0 else 2.0 ** ((g - 1) // 2)
        for d in range(7):
            nw32[ROW_S + d, g * 7 + d] = scale
        lo, hi = g * 7, (g + 1) * 7
        if g == 0:
            nw32[ROW_MASK_ID, lo:hi] = 1.0
        elif g % 2 == 1:
            nw32[ROW_MASK_SIN, lo:hi] = 1.0
        else:
            nw32[ROW_MASK_COS, lo:hi] = 1.0
    nw32[ROW_MASK_X4, 0:32] = 1.0
    nw32[ROW_MASK_Q4, 32:64] = 1.0

    # fused layer 1: rows permuted to match the full-pose PE column order
    for g in range(NUM_GROUPS):
        for d in range(7):
            c = g * 7 + d
            if d < 3:
                nw16[R16_W1 + c, 0:64] = p["xw1"][g * 3 + d, :]
            else:
                nw16[R16_W1 + c, 64:128] = p["qw1"][g * 4 + (d - 3), :]
    nw32[ROW_B1, 0:64] = p["xb1"][0]
    nw32[ROW_B1, 64:128] = p["qb1"][0]

    # layer 2 (dense 64-row blocks, no K padding)
    nw16[R16_W2X:R16_W2X + 64, :] = p["xw2"]
    nw16[R16_W2Q:R16_W2Q + 64, :] = p["qw2"]
    nw32[ROW_B2X, :] = p["xb2"][0]
    nw32[ROW_B2Q, :] = p["qb2"][0]

    # layer 3
    wd16[R16_W3X:R16_W3X + 128, :] = p["xw3"]
    wd16[R16_W3Q:R16_W3Q + 128, :] = p["qw3"]
    wd32[WROW_B3X, :] = p["xb3"][0]
    wd32[WROW_B3Q, :] = p["qb3"][0]

    # layer 4 (single de-zeroed block: x -> cols 0:32, q -> cols 32:64)
    nw16[R16_W4:R16_W4 + 256, 0:32] = p["xw4"]
    nw16[R16_W4:R16_W4 + 256, 32:64] = p["qw4"]
    nw32[ROW_B4, 0:32] = p["xb4"][0]
    nw32[ROW_B4, 32:64] = p["qb4"][0]

    return (jnp.asarray(nw32), jnp.asarray(wd32),
            jnp.asarray(nw16, jnp.bfloat16), jnp.asarray(wd16, jnp.bfloat16))


# ----------------------------------------------------------------------------
# Pure-JAX reference (mirrors the PyTorch forward, all f32)
# ----------------------------------------------------------------------------
def reference_forward(pose, params):
    def pos_enc(t):
        parts = [t]
        for i in range(NUM_ENCODING_FUNCTIONS):
            f = jnp.float32(2.0 ** i)
            parts.append(jnp.sin(t * f))
            parts.append(jnp.cos(t * f))
        return jnp.concatenate(parts, axis=-1)

    def mlp(h, pfx):
        for i in range(1, 4):
            h = jax.nn.relu(h @ params[f"{pfx}w{i}"] + params[f"{pfx}b{i}"])
        return h @ params[f"{pfx}w4"] + params[f"{pfx}b4"]

    return mlp(pos_enc(pose[:, :3]), "x"), mlp(pos_enc(pose[:, 3:]), "q")


if __name__ == "__main__":
    key = jax.random.PRNGKey(0)
    k_pose, k_params = jax.random.split(key)
    pose = jax.random.normal(k_pose, (BATCH, 7), jnp.float32)
    pose8 = jnp.pad(pose, ((0, 0), (0, 1)))          # caller-side pad, col 7 = 0
    params = make_params(k_params)
    nw32, wd32, nw16, wd16 = pack_params(params)

    latents = pose_encoder_forward(pose8, nw32, wd32, nw16, wd16)    # [B, 64]
    latents = jax.block_until_ready(latents)
    latent_x = latents[:, 0:ENCODER_DIM]
    latent_q = latents[:, ENCODER_DIM:2 * ENCODER_DIM]
    assert latent_x.shape == (BATCH, ENCODER_DIM)
    assert latent_q.shape == (BATCH, ENCODER_DIM)

    # (a) exact-mapping check: reference using the same bf16-stored weights
    q_params = {k: (v.astype(jnp.bfloat16).astype(jnp.float32) if k[1] == "w" else v)
                for k, v in params.items()}
    refq_x, refq_q = reference_forward(pose, q_params)
    np.testing.assert_allclose(np.asarray(latent_x), np.asarray(refq_x),
                               rtol=2e-3, atol=2e-3)
    np.testing.assert_allclose(np.asarray(latent_q), np.asarray(refq_q),
                               rtol=2e-3, atol=2e-3)

    # (b) fidelity vs. the full-f32 module forward (tolerance covers the
    #     deliberate bf16 weight storage; PE / biases / activations stay f32)
    ref_x, ref_q = reference_forward(pose, params)
    np.testing.assert_allclose(np.asarray(latent_x), np.asarray(ref_x),
                               rtol=1e-2, atol=1e-2)
    np.testing.assert_allclose(np.asarray(latent_q), np.asarray(ref_q),
                               rtol=1e-2, atol=1e-2)

    print("KERNEL_OK")
</pallas_src>

<mosaic_0001>
module attributes {stable_mosaic.version = 11 : i64} {
  func.func @pose_encoder_kernel(%arg0: i32, %arg1: memref<8x8xf32, #tpu.memory_space<vmem>>, %arg2: memref<24x128xf32, #tpu.memory_space<vmem>>, %arg3: memref<8x256xf32, #tpu.memory_space<vmem>>, %arg4: memref<512x128xbf16, #tpu.memory_space<vmem>>, %arg5: memref<256x256xbf16, #tpu.memory_space<vmem>>, %arg6: memref<8x128xf32, #tpu.memory_space<vmem>>) attributes {dimension_semantics = [#tpu.dimension_semantics<parallel>], iteration_bounds = array<i64: 1>, scalar_prefetch = 0 : i64, scratch_operands = 0 : i64, tpu.core_type = #tpu.core_type<tc>, window_params = [{transform_indices = @transform_0, window_bounds = array<i64: 8, 8>}, {pipeline_mode = #tpu.pipeline_mode<synchronous>, transform_indices = @transform_1, window_bounds = array<i64: 24, 128>}, {pipeline_mode = #tpu.pipeline_mode<synchronous>, transform_indices = @transform_2, window_bounds = array<i64: 8, 256>}, {pipeline_mode = #tpu.pipeline_mode<synchronous>, transform_indices = @transform_3, window_bounds = array<i64: 512, 128>}, {pipeline_mode = #tpu.pipeline_mode<synchronous>, transform_indices = @transform_4, window_bounds = array<i64: 256, 256>}, {transform_indices = @transform_5, window_bounds = array<i64: 8, 128>}]} {
    %c0 = arith.constant 0 : index
    %c0_0 = arith.constant 0 : index
    %0 = vector.load %arg1[%c0, %c0_0] : memref<8x8xf32, #tpu.memory_space<vmem>>, vector<8x8xf32>
    %c0_1 = arith.constant 0 : index
    %c0_2 = arith.constant 0 : index
    %1 = vector.load %arg2[%c0_1, %c0_2] : memref<24x128xf32, #tpu.memory_space<vmem>>, vector<8x128xf32>
    %c8 = arith.constant 8 : index
    %c0_3 = arith.constant 0 : index
    %2 = vector.load %arg2[%c8, %c0_3] : memref<24x128xf32, #tpu.memory_space<vmem>>, vector<1x128xf32>
    %c9 = arith.constant 9 : index
    %c0_4 = arith.constant 0 : index
    %3 = vector.load %arg2[%c9, %c0_4] : memref<24x128xf32, #tpu.memory_space<vmem>>, vector<1x128xf32>
    %c10 = arith.constant 10 : index
    %c0_5 = arith.constant 0 : index
    %4 = vector.load %arg2[%c10, %c0_5] : memref<24x128xf32, #tpu.memory_space<vmem>>, vector<1x128xf32>
    %c11 = arith.constant 11 : index
    %c0_6 = arith.constant 0 : index
    %5 = vector.load %arg2[%c11, %c0_6] : memref<24x128xf32, #tpu.memory_space<vmem>>, vector<1x128xf32>
    %c12 = arith.constant 12 : index
    %c0_7 = arith.constant 0 : index
    %6 = vector.load %arg2[%c12, %c0_7] : memref<24x128xf32, #tpu.memory_space<vmem>>, vector<1x128xf32>
    %c13 = arith.constant 13 : index
    %c0_8 = arith.constant 0 : index
    %7 = vector.load %arg2[%c13, %c0_8] : memref<24x128xf32, #tpu.memory_space<vmem>>, vector<1x128xf32>
    %c14 = arith.constant 14 : index
    %c0_9 = arith.constant 0 : index
    %8 = vector.load %arg2[%c14, %c0_9] : memref<24x128xf32, #tpu.memory_space<vmem>>, vector<1x128xf32>
    %c15 = arith.constant 15 : index
    %c0_10 = arith.constant 0 : index
    %9 = vector.load %arg2[%c15, %c0_10] : memref<24x128xf32, #tpu.memory_space<vmem>>, vector<1x128xf32>
    %c16 = arith.constant 16 : index
    %c0_11 = arith.constant 0 : index
    %10 = vector.load %arg2[%c16, %c0_11] : memref<24x128xf32, #tpu.memory_space<vmem>>, vector<1x128xf32>
    %c0_12 = arith.constant 0 : index
    %c0_13 = arith.constant 0 : index
    %11 = vector.load %arg3[%c0_12, %c0_13] : memref<8x256xf32, #tpu.memory_space<vmem>>, vector<1x256xf32>
    %c1 = arith.constant 1 : index
    %c0_14 = arith.constant 0 : index
    %12 = vector.load %arg3[%c1, %c0_14] : memref<8x256xf32, #tpu.memory_space<vmem>>, vector<1x256xf32>
    %c0_15 = arith.constant 0 : index
    %c0_16 = arith.constant 0 : index
    %13 = vector.load %arg4[%c0_15, %c0_16] : memref<512x128xbf16, #tpu.memory_space<vmem>>, vector<128x128xbf16>
    %14 = arith.extf %13 : vector<128x128xbf16> to vector<128x128xf32>
    %c128 = arith.constant 128 : index
    %c0_17 = arith.constant 0 : index
    %15 = vector.load %arg4[%c128, %c0_17] : memref<512x128xbf16, #tpu.memory_space<vmem>>, vector<64x128xbf16>
    %16 = arith.extf %15 : vector<64x128xbf16> to vector<64x128xf32>
    %c192 = arith.constant 192 : index
    %c0_18 = arith.constant 0 : index
    %17 = vector.load %arg4[%c192, %c0_18] : memref<512x128xbf16, #tpu.memory_space<vmem>>, vector<64x128xbf16>
    %18 = arith.extf %17 : vector<64x128xbf16> to vector<64x128xf32>
    %c256 = arith.constant 256 : index
    %c0_19 = arith.constant 0 : index
    %19 = vector.load %arg4[%c256, %c0_19] : memref<512x128xbf16, #tpu.memory_space<vmem>>, vector<256x128xbf16>
    %20 = arith.extf %19 : vector<256x128xbf16> to vector<256x128xf32>
    %c0_20 = arith.constant 0 : index
    %c0_21 = arith.constant 0 : index
    %21 = vector.load %arg5[%c0_20, %c0_21] : memref<256x256xbf16, #tpu.memory_space<vmem>>, vector<128x256xbf16>
    %22 = arith.extf %21 : vector<128x256xbf16> to vector<128x256xf32>
    %c128_22 = arith.constant 128 : index
    %c0_23 = arith.constant 0 : index
    %23 = vector.load %arg5[%c128_22, %c0_23] : memref<256x256xbf16, #tpu.memory_space<vmem>>, vector<128x256xbf16>
    %24 = arith.extf %23 : vector<128x256xbf16> to vector<128x256xf32>
    %cst = arith.constant dense<0.000000e+00> : vector<8x128xf32>
    %25 = tpu.matmul %0, %1, %cst {dimension_numbers = #tpu.dot_dimension_numbers<[1], [0], [0], [1], [0, 0, 1, 1], [], []>} : vector<8x8xf32>, vector<8x128xf32>, vector<8x128xf32> -> vector<8x128xf32>
    %26 = vector.broadcast %2 : vector<1x128xf32> to vector<8x128xf32>
    %27 = arith.mulf %26, %25 : vector<8x128xf32>
    %28 = math.sin %25 : vector<8x128xf32>
    %29 = vector.broadcast %3 : vector<1x128xf32> to vector<8x128xf32>
    %30 = arith.mulf %29, %28 : vector<8x128xf32>
    %31 = arith.addf %27, %30 : vector<8x128xf32>
    %32 = math.cos %25 : vector<8x128xf32>
    %33 = vector.broadcast %4 : vector<1x128xf32> to vector<8x128xf32>
    %34 = arith.mulf %33, %32 : vector<8x128xf32>
    %35 = arith.addf %31, %34 : vector<8x128xf32>
    %cst_24 = arith.constant dense<0.000000e+00> : vector<8x128xf32>
    %36 = tpu.matmul %35, %14, %cst_24 {dimension_numbers = #tpu.dot_dimension_numbers<[1], [0], [0], [1], [0, 0, 1, 1], [], []>} : vector<8x128xf32>, vector<128x128xf32>, vector<8x128xf32> -> vector<8x128xf32>
    %37 = vector.broadcast %7 : vector<1x128xf32> to vector<8x128xf32>
    %38 = arith.addf %36, %37 : vector<8x128xf32>
    %cst_25 = arith.constant 0.000000e+00 : f32
    %39 = vector.broadcast %cst_25 : f32 to vector<8x128xf32>
    %40 = arith.maximumf %38, %39 : vector<8x128xf32>
    %41 = vector.extract_strided_slice %40 {offsets = [0, 0], sizes = [8, 64], strides = [1, 1]} : vector<8x128xf32> to vector<8x64xf32>
    %cst_26 = arith.constant dense<0.000000e+00> : vector<8x128xf32>
    %42 = tpu.matmul %41, %16, %cst_26 {dimension_numbers = #tpu.dot_dimension_numbers<[1], [0], [0], [1], [0, 0, 1, 1], [], []>} : vector<8x64xf32>, vector<64x128xf32>, vector<8x128xf32> -> vector<8x128xf32>
    %43 = vector.broadcast %8 : vector<1x128xf32> to vector<8x128xf32>
    %44 = arith.addf %42, %43 : vector<8x128xf32>
    %cst_27 = arith.constant 0.000000e+00 : f32
    %45 = vector.broadcast %cst_27 : f32 to vector<8x128xf32>
    %46 = arith.maximumf %44, %45 : vector<8x128xf32>
    %47 = vector.extract_strided_slice %40 {offsets = [0, 64], sizes = [8, 64], strides = [1, 1]} : vector<8x128xf32> to vector<8x64xf32>
    %cst_28 = arith.constant dense<0.000000e+00> : vector<8x128xf32>
    %48 = tpu.matmul %47, %18, %cst_28 {dimension_numbers = #tpu.dot_dimension_numbers<[1], [0], [0], [1], [0, 0, 1, 1], [], []>} : vector<8x64xf32>, vector<64x128xf32>, vector<8x128xf32> -> vector<8x128xf32>
    %49 = vector.broadcast %9 : vector<1x128xf32> to vector<8x128xf32>
    %50 = arith.addf %48, %49 : vector<8x128xf32>
    %cst_29 = arith.constant 0.000000e+00 : f32
    %51 = vector.broadcast %cst_29 : f32 to vector<8x128xf32>
    %52 = arith.maximumf %50, %51 : vector<8x128xf32>
    %cst_30 = arith.constant dense<0.000000e+00> : vector<8x256xf32>
    %53 = tpu.matmul %46, %22, %cst_30 {dimension_numbers = #tpu.dot_dimension_numbers<[1], [0], [0], [1], [0, 0, 1, 1], [], []>} : vector<8x128xf32>, vector<128x256xf32>, vector<8x256xf32> -> vector<8x256xf32>
    %54 = vector.broadcast %11 : vector<1x256xf32> to vector<8x256xf32>
    %55 = arith.addf %53, %54 : vector<8x256xf32>
    %cst_31 = arith.constant 0.000000e+00 : f32
    %56 = vector.broadcast %cst_31 : f32 to vector<8x256xf32>
    %57 = arith.maximumf %55, %56 : vector<8x256xf32>
    %cst_32 = arith.constant dense<0.000000e+00> : vector<8x256xf32>
    %58 = tpu.matmul %52, %24, %cst_32 {dimension_numbers = #tpu.dot_dimension_numbers<[1], [0], [0], [1], [0, 0, 1, 1], [], []>} : vector<8x128xf32>, vector<128x256xf32>, vector<8x256xf32> -> vector<8x256xf32>
    %59 = vector.broadcast %12 : vector<1x256xf32> to vector<8x256xf32>
    %60 = arith.addf %58, %59 : vector<8x256xf32>
    %cst_33 = arith.constant 0.000000e+00 : f32
    %61 = vector.broadcast %cst_33 : f32 to vector<8x256xf32>
    %62 = arith.maximumf %60, %61 : vector<8x256xf32>
    %cst_34 = arith.constant dense<0.000000e+00> : vector<8x128xf32>
    %63 = tpu.matmul %57, %20, %cst_34 {dimension_numbers = #tpu.dot_dimension_numbers<[1], [0], [0], [1], [0, 0, 1, 1], [], []>} : vector<8x256xf32>, vector<256x128xf32>, vector<8x128xf32> -> vector<8x128xf32>
    %64 = vector.broadcast %5 : vector<1x128xf32> to vector<8x128xf32>
    %65 = arith.mulf %64, %63 : vector<8x128xf32>
    %cst_35 = arith.constant dense<0.000000e+00> : vector<8x128xf32>
    %66 = tpu.matmul %62, %20, %cst_35 {dimension_numbers = #tpu.dot_dimension_numbers<[1], [0], [0], [1], [0, 0, 1, 1], [], []>} : vector<8x256xf32>, vector<256x128xf32>, vector<8x128xf32> -> vector<8x128xf32>
    %67 = vector.broadcast %6 : vector<1x128xf32> to vector<8x128xf32>
    %68 = arith.mulf %67, %66 : vector<8x128xf32>
    %69 = arith.addf %65, %68 : vector<8x128xf32>
    %70 = vector.broadcast %10 : vector<1x128xf32> to vector<8x128xf32>
    %71 = arith.addf %69, %70 : vector<8x128xf32>
    %c0_36 = arith.constant 0 : index
    %c0_37 = arith.constant 0 : index
    %72 = vector.load %arg6[%c0_36, %c0_37] : memref<8x128xf32, #tpu.memory_space<vmem>>, vector<8x128xf32>
    tpu.vector_store %arg6[%c0_36, %c0_37], %71 {strides = array<i32>} : memref<8x128xf32, #tpu.memory_space<vmem>>, vector<8x128xf32>,
    return
  }
  func.func @transform_0(%arg0: i32) -> (i32, i32) {
    %c0_i32 = arith.constant 0 : i32
    %c0_i32_0 = arith.constant 0 : i32
    return %arg0, %c0_i32 : i32, i32
  }
  func.func @transform_1(%arg0: i32) -> (i32, i32) {
    %c0_i32 = arith.constant 0 : i32
    %c0_i32_0 = arith.constant 0 : i32
    %c0_i32_1 = arith.constant 0 : i32
    return %c0_i32, %c0_i32_0 : i32, i32
  }
  func.func @transform_2(%arg0: i32) -> (i32, i32) {
    %c0_i32 = arith.constant 0 : i32
    %c0_i32_0 = arith.constant 0 : i32
    %c0_i32_1 = arith.constant 0 : i32
    return %c0_i32, %c0_i32_0 : i32, i32
  }
  func.func @transform_3(%arg0: i32) -> (i32, i32) {
    %c0_i32 = arith.constant 0 : i32
    %c0_i32_0 = arith.constant 0 : i32
    %c0_i32_1 = arith.constant 0 : i32
    return %c0_i32, %c0_i32_0 : i32, i32
  }
  func.func @transform_4(%arg0: i32) -> (i32, i32) {
    %c0_i32 = arith.constant 0 : i32
    %c0_i32_0 = arith.constant 0 : i32
    %c0_i32_1 = arith.constant 0 : i32
    return %c0_i32, %c0_i32_0 : i32, i32
  }
  func.func @transform_5(%arg0: i32) -> (i32, i32) {
    %c0_i32 = arith.constant 0 : i32
    %c0_i32_0 = arith.constant 0 : i32
    return %arg0, %c0_i32 : i32, i32
  }
}

</mosaic_0001>

<bundles_post_ra>
// kernel: pose_encoder_forward.1
= control target key start
LH: loop header
LB: loop body
LE: loop exit
PB: predicated region body
PF: predicated region fallthrough
CT: control target
= control target key end

     0   :  { %10 = vsyncpa [#allocation3], 0  ;;  %s2164_s0 = inlined_call_operand.hbm [shape: f32[8,8], index: 0, kind: input, shape index: {}]   ;;  %s2165_s1 = inlined_call_operand.hbm [shape: f32[24,128], index: 1, kind: input, shape index: {}]   ;;  %s2166_s2 = inlined_call_operand.hbm [shape: f32[8,256], index: 2, kind: input, shape index: {}]   ;;  %s2167_s3 = inlined_call_operand.hbm [shape: bf16[512,128], index: 3, kind: input, shape index: {}]   ;;  %s2168_s4 = inlined_call_operand.hbm [shape: bf16[256,256], index: 4, kind: input, shape index: {}]   ;;  %s2169_s5 = inlined_call_operand.hbm [shape: f32[8,128], index: 5, kind: output, shape index: {}]  }
   0x1   :  { %11 = vsyncpa [#allocation6], 0 }
   0x2   :  { %12 = vsyncpa [#allocation9], 0 }
   0x3   :  { %13 = vsyncpa [#allocation4], 0  ;;  %s1983_s18 = smov [#allocation5]   ;;  %s1843_s22 = scalar_lea.hbm %s2165_s1, 384 }
   0x4   :  { %s29_s19 = sshll.u32 %s1983_s18, 4  ;;  %p1844_p0 = scmp.ne.s32.totalorder %s2165_s1, %s1843_s22  ;;  %s30_s19 = int_to_ptr.vmem [resolvable:$true] %s29_s19 }
   0x5   :  { %p1847_p1 = scmp.lt.u32.totalorder %s1843_s22, %s2165_s1 }
   0x7   :  { %p1849_p2 = pnand %p1847_p1, %p1844_p0 }
   0x9   :  { %1852 = shalt.err (!%p1849_p2)
}
   0xa   :  { %s1853_s27 = scalar_lea.vmem %s30_s19, 384  ;;  %p1858_p4 = scmp.lt.s32.totalorder %s30_s19, %s30_s19 }
   0xb   :  { %p1854_p3 = scmp.ne.s32.totalorder %s30_s19, %s1853_s27  ;;  %p1859_p5 = scmp.lt.s32.totalorder %s1853_s27, %s1853_s27 }
   0xd   :  { %p1860_p6 = por %p1859_p5, %p1858_p4 }
   0xf   :  { %p1861_p7 = pnand %p1860_p6, %p1854_p3 }
  0x11   :  { %1864 = shalt.err (!%p1861_p7)
}
  0x12   :  { %s1984_s28 = smov 128   ;;  %s1985_s29 = smov 8  }
  0x13   :  { %35 = dma.hbm_to_vmem [thread:$0]  %s2165_s1, 384, %s30_s19, [#allocation6], %s1984_s28, %s1984_s28, %s1985_s29  }
  0x14   :  { %s1986_s7 = smov [#allocation8]   ;;  %s1865_s11 = scalar_lea.hbm %s2167_s3, 4096 }
  0x15   :  { %s51_s8 = sshll.u32 %s1986_s7, 4  ;;  %p1866_p8 = scmp.ne.s32.totalorder %s2167_s3, %s1865_s11  ;;  %s52_s8 = int_to_ptr.vmem [resolvable:$true] %s51_s8 }
  0x16   :  { %p1869_p9 = scmp.lt.u32.totalorder %s1865_s11, %s2167_s3 }
  0x18   :  { %p1871_p10 = pnand %p1869_p9, %p1866_p8 }
  0x1a   :  { %1874 = shalt.err (!%p1871_p10)
}
  0x1b   :  { %s1875_s16 = scalar_lea.vmem %s52_s8, 4096  ;;  %p1880_p12 = scmp.lt.s32.totalorder %s52_s8, %s52_s8 }
  0x1c   :  { %p1876_p11 = scmp.ne.s32.totalorder %s52_s8, %s1875_s16  ;;  %p1881_p13 = scmp.lt.s32.totalorder %s1875_s16, %s1875_s16 }
  0x1e   :  { %p1882_p0 = por %p1881_p13, %p1880_p12 }
  0x20   :  { %p1883_p1 = pnand %p1882_p0, %p1876_p11 }
  0x22   :  { %1886 = shalt.err (!%p1883_p1)
}
  0x23   :  { %s1987_s1 = smov 64   ;;  %s1988_s17 = smov 4  }
  0x24   :  { %57 = dma.hbm_to_vmem [thread:$0]  %s2167_s3, 4096, %s52_s8, [#allocation9], %s1987_s1, %s1987_s1, %s1988_s17  }
  0x25   :  { %s1989_s20 = smov [#allocation2]   ;;  %s1990_s22 = smov [#allocation7]  }
  0x26   :  { %s20_s21 = sshll.u32 %s1989_s20, 4  ;;  %s42_s23 = sshll.u32 %s1990_s22, 4  ;;  %s21_s21 = int_to_ptr.vmem [resolvable:$true] %s20_s21  ;;  %s43_s23 = int_to_ptr.vmem [resolvable:$true] %s42_s23 }
  0x27   :  { %s1887_s26 = scalar_lea.hbm %s2164_s0, 128 }
  0x28   :  { %p1888_p2 = scmp.ne.s32.totalorder %s2164_s0, %s1887_s26  ;;  %p1891_p3 = scmp.lt.u32.totalorder %s1887_s26, %s2164_s0 }
  0x2a   :  { %p1893_p4 = pnand %p1891_p3, %p1888_p2 }
  0x2c   :  { %1896 = shalt.err (!%p1893_p4)
}
  0x2d   :  { %s1897_s3 = scalar_lea.vmem %s21_s21, 128  ;;  %p1902_p6 = scmp.lt.s32.totalorder %s21_s21, %s21_s21 }
  0x2e   :  { %p1898_p5 = scmp.ne.s32.totalorder %s21_s21, %s1897_s3  ;;  %p1903_p7 = scmp.lt.s32.totalorder %s1897_s3, %s1897_s3 }
  0x30   :  { %p1904_p8 = por %p1903_p7, %p1902_p6 }
  0x32   :  { %p1905_p9 = pnand %p1904_p8, %p1898_p5 }
  0x34   :  { %1908 = shalt.err (!%p1905_p9)
}
  0x35   :  { %23 = dma.hbm_to_vmem [thread:$0]  %s2164_s0, 128, %s21_s21, [#allocation3]  }
  0x36   :  { %s1909_s12 = scalar_lea.hbm %s2166_s2, 256 }
  0x37   :  { %p1910_p10 = scmp.ne.s32.totalorder %s2166_s2, %s1909_s12  ;;  %p1913_p11 = scmp.lt.u32.totalorder %s1909_s12, %s2166_s2 }
  0x39   :  { %p1915_p12 = pnand %p1913_p11, %p1910_p10 }
  0x3b   :  { %1918 = shalt.err (!%p1915_p12)
}
  0x3c   :  { %s1919_s17 = scalar_lea.vmem %s43_s23, 256  ;;  %p1924_p0 = scmp.lt.s32.totalorder %s43_s23, %s43_s23 }
  0x3d   :  { %p1920_p13 = scmp.ne.s32.totalorder %s43_s23, %s1919_s17  ;;  %p1925_p1 = scmp.lt.s32.totalorder %s1919_s17, %s1919_s17 }
  0x3f   :  { %p1926_p2 = por %p1925_p1, %p1924_p0 }
  0x41   :  { %p1927_p3 = pnand %p1926_p2, %p1920_p13 }
  0x43   :  { %1930 = shalt.err (!%p1927_p3)
}
  0x44   :  { %45 = dma.hbm_to_vmem [thread:$0]  %s2166_s2, 256, %s43_s23, [#allocation6]  }
  0x45   :  { %s1991_s19 = smov [#allocation10]   ;;  %s1931_s24 = scalar_lea.hbm %s2168_s4, 4096 }
  0x46   :  { %s63_s20 = sshll.u32 %s1991_s19, 4  ;;  %p1932_p4 = scmp.ne.s32.totalorder %s2168_s4, %s1931_s24  ;;  %s64_s20 = int_to_ptr.vmem [resolvable:$true] %s63_s20 }
  0x47   :  { %p1935_p5 = scmp.lt.u32.totalorder %s1931_s24, %s2168_s4 }
  0x49   :  { %p1937_p6 = pnand %p1935_p5, %p1932_p4 }
  0x4b   :  { %1940 = shalt.err (!%p1937_p6)
}
  0x4c   :  { %s1941_s6 = scalar_lea.vmem %s64_s20, 4096  ;;  %p1946_p8 = scmp.lt.s32.totalorder %s64_s20, %s64_s20 }
  0x4d   :  { %p1942_p7 = scmp.ne.s32.totalorder %s64_s20, %s1941_s6  ;;  %p1947_p9 = scmp.lt.s32.totalorder %s1941_s6, %s1941_s6 }
  0x4f   :  { %p1948_p10 = por %p1947_p9, %p1946_p8 }
  0x51   :  { %p1949_p11 = pnand %p1948_p10, %p1942_p7 }
  0x53   :  { %1952 = shalt.err (!%p1949_p11)
}
  0x54   :  { %69 = dma.hbm_to_vmem [thread:$0]  %s2168_s4, 4096, %s64_s20, [#allocation9], %s1984_s28, %s1984_s28, %s1985_s29  }
  0x55   :  { %1975 = dma.done.wait [#allocation3], 128  }
  0x56   :  { %1976 = vsyncadd [#allocation3], 4294967168 }
  0x57   :  { %1977 = dma.done.wait [#allocation6], 640  }
  0x58   :  { %1978 = vsyncadd [#allocation6], 4294966656 }
  0x59   :  { %1979 = dma.done.wait [#allocation9], 8192  }
  0x5a   :  { %1980 = vsyncadd [#allocation9], 4294959104  ;;  %v1992_v0 = vmov 0.0   ;;  %vm1993_vm0 = vmmov 0   ;;  %vm323_vm1 = vcmask 64512   ;;  %v86_v1 = vld [vmem:[#allocation5] sm:$0xff] }
  0x5b   :  { %1482 = vmatprep.subr.mxu0 %v1992_v0  ;;  %1484 = vmatprep.mubr.msk.f32.mxu0 %vm1993_vm0, %v1992_v0  ;;  %v85_v2 = vld [vmem:[#allocation2] sm:$0xff]  ;;  %v1994_v3 = vmov 0.0|0.0   ;;  %v1217_v4 = vld [vmem:[#allocation8] sm:$0xff]   ;;  %v1344_v5 = vld [vmem:[#allocation8 + $0x8] sm:$0xff]   ;;  %v1995_v27 = vmov 683565275  }
  0x5c   :  { %1519 = vmatprep.mubr.msk.f32.mxu1 %vm1993_vm0, %v1992_v0  ;;  %1483 = vmatpush3.msra.mxu0 %v86_v1  ;;  %v1345_v6 = vld [vmem:[#allocation8 + $0x10] sm:$0xff]   ;;  %v1346_v7 = vld [vmem:[#allocation8 + $0x18] sm:$0xff]   ;;  %v1347_v8 = vld [vmem:[#allocation8 + $0x20] sm:$0xff]   ;;  %v1996_v29 = vmov 2475754826   ;;  %s2001_s4 = smov [#allocation11]  }
  0x5d   :  { %1485 = vmatmul.mubr.msk.f32.vlgmr.msra.gmra.mrb[0].mxu0 %vm323_vm1, %v85_v2  ;;  %1560 = vmatprep.subr.bf16.mxu1 %v1994_v3  ;;  %v1348_v9 = vld [vmem:[#allocation8 + $0x28] sm:$0xff]   ;;  %v1349_v10 = vld [vmem:[#allocation8 + $0x30] sm:$0xff]   ;;  %v1350_v11 = vld [vmem:[#allocation8 + $0x38] sm:$0xff]   ;;  %v1997_v32 = vmov 2131351028   ;;  %s1185_s28 = sshll.u32 %s2001_s4, 4  ;;  %s1186_s28 = int_to_ptr.vmem [resolvable:$true] %s1185_s28 }
  0x5e   :  { %1538 = vmatprep.mubr.msk.f32.mxu0 %vm1993_vm0, %v1992_v0  ;;  %1584 = vmatprep.subr.bf16.mxu0 %v1994_v3  ;;  %v1351_v12 = vld [vmem:[#allocation8 + $0x40] sm:$0xff]   ;;  %v1352_v13 = vld [vmem:[#allocation8 + $0x48] sm:$0xff]   ;;  %v1353_v14 = vld [vmem:[#allocation8 + $0x50] sm:$0xff]   ;;  %v1998_v35 = vmov 2102212464   ;;  %s1953_s29 = scalar_lea.vmem %s1186_s28, 128  ;;  %p1958_p13 = scmp.lt.s32.totalorder %s1186_s28, %s1186_s28 }
  0x5f   :  { %1562 = vmatpush3.bf16.msra.mxu1 %v1217_v4  ;;  %1586 = vmatpush3.bf16.msra.mxu0 %v1351_v12  ;;  %v1999_v38 = vmov 920167782   ;;  %v2000_v41 = vmov 1326507024   ;;  %p1954_p12 = scmp.ne.s32.totalorder %s1186_s28, %s1953_s29  ;;  %p1959_p0 = scmp.lt.s32.totalorder %s1953_s29, %s1953_s29 }
  0x60   :  { %1563 = vmatprep.subr.bf16.mxu1 %v1994_v3  ;;  %1587 = vmatprep.subr.bf16.mxu0 %v1994_v3 }
  0x61   :  { %p1960_p1 = por %p1959_p0, %p1958_p13 }
  0x63   :  { %1565 = vmatpush3.bf16.msra.mxu1 %v1344_v5  ;;  %1589 = vmatpush3.bf16.msra.mxu0 %v1352_v13  ;;  %p1961_p2 = pnand %p1960_p1, %p1954_p12 }
  0x64   :  { %1566 = vmatprep.subr.bf16.mxu1 %v1994_v3  ;;  %1590 = vmatprep.subr.bf16.mxu0 %v1994_v3 }
  0x67   :  { %1568 = vmatpush3.bf16.msra.mxu1 %v1345_v6  ;;  %1592 = vmatpush3.bf16.msra.mxu0 %v1353_v14 }
  0x68   :  { %1569 = vmatprep.subr.bf16.mxu1 %v1994_v3  ;;  %1593 = vmatprep.subr.bf16.mxu0 %v1994_v3 }
  0x6b   :  { %1571 = vmatpush3.bf16.msra.mxu1 %v1346_v7 }
  0x6c   :  { %1572 = vmatprep.subr.bf16.mxu1 %v1994_v3 }
  0x6f   :  { %1574 = vmatpush3.bf16.msra.mxu1 %v1347_v8 }
  0x70   :  { %1575 = vmatprep.subr.bf16.mxu1 %v1994_v3 }
  0x73   :  { %1577 = vmatpush3.bf16.msra.mxu1 %v1348_v9 }
  0x74   :  { %1578 = vmatprep.subr.bf16.mxu1 %v1994_v3 }
  0x77   :  { %1580 = vmatpush3.bf16.msra.mxu1 %v1349_v10 }
  0x78   :  { %1581 = vmatprep.subr.bf16.mxu1 %v1994_v3 }
  0x7b   :  { %1583 = vmatpush3.bf16.msra.mxu1 %v1350_v11 }
 0x130   :  { %v2119_v15 = vpop.f32.mrb[0].mxu0 }
 0x131   :  { %v405_v16 = vand.u32 2139095040, %v2119_v15  ;;  %v1486_v17 = vpop.f32.mrb[1].mxu0  ;;  %v402_v21 = vand.u32 2147483647, %v2119_v15  ;;  %vm404_vm9 = vcmp.lt.s32.totalorder %v2119_v15, 0 }
 0x133   :  { %v406_v18 = vshrl.u32 %v405_v16, 23  ;;  %v409_v24 = vand.u32 8388607, %v402_v21  ;;  %vm403_vm10 = vcmp.le.f32.partialorder %v402_v21, 0.7853982 }
 0x135   :  { %v1198_v19 = vadd.s32 4294967169, %v406_v18  ;;  %v410_v43 = vor.u32 8388608, %v409_v24 }
 0x137   :  { %v412_v20 = vadd.s32 1, %v1198_v19  ;;  %v450_v57 = vshll.u32 %v410_v43, 8 }
 0x139   :  { %vm413_vm2 = vcmp.gt.s32.totalorder %v412_v20, 0 }
 0x13a   :  { %v414_v22 = vsel %vm413_vm2, %v412_v20, 0  ;;  %vm494_vm2 = vweird.f32 %v2119_v15 }
 0x13b   :  { %v416_v23 = vand.u32 31, %v414_v22  ;;  %v415_v26 = vshrl.u32 %v414_v22, 5 }
 0x13d   :  { %v417_v25 = vsub.s32 32, %v416_v23  ;;  %v419_v28 = vshll.u32 %v1995_v27, %v416_v23  ;;  %v422_v30 = vshll.u32 %v1996_v29, %v416_v23  ;;  %v425_v34 = vshll.u32 %v1997_v32, %v416_v23 }
 0x13e   :  { %v428_v37 = vshll.u32 %v1998_v35, %v416_v23  ;;  %v431_v40 = vshll.u32 %v1999_v38, %v416_v23  ;;  %vm434_vm3 = vcmp.lt.s32.totalorder %v415_v26, 1  ;;  %vm437_vm4 = vcmp.lt.s32.totalorder %v415_v26, 4 }
 0x13f   :  { %v420_v31 = vshrl.u32 %v1996_v29, %v417_v25  ;;  %v423_v33 = vshrl.u32 %v1997_v32, %v417_v25  ;;  %v426_v36 = vshrl.u32 %v1998_v35, %v417_v25  ;;  %v429_v39 = vshrl.u32 %v1999_v38, %v417_v25 }
 0x140   :  { %v432_v42 = vshrl.u32 %v2000_v41, %v417_v25  ;;  %v418_v52 = vshrl.u32 %v1995_v27, %v417_v25  ;;  %vm436_vm5 = vcmp.lt.s32.totalorder %v415_v26, 3  ;;  %vm435_vm6 = vcmp.lt.s32.totalorder %v415_v26, 2 }
 0x141   :  { %v421_v44 = vor.u32 %v420_v31, %v419_v28  ;;  %v424_v45 = vor.u32 %v423_v33, %v422_v30  ;;  %v427_v46 = vor.u32 %v426_v36, %v425_v34  ;;  %v430_v47 = vor.u32 %v429_v39, %v428_v37 }
 0x142   :  { %v433_v48 = vor.u32 %v432_v42, %v431_v40 }
 0x143   :  { %v439_v49 = vsel %vm437_vm4, %v427_v46, 2102212464  ;;  %v442_v50 = vsel %vm434_vm3, %v421_v44, %v424_v45  ;;  %v446_v51 = vsel %vm434_vm3, %v424_v45, %v427_v46  ;;  %v443_v53 = vsel %vm437_vm4, %v430_v47, 920167782 }
 0x144   :  { %v447_v54 = vsel %vm437_vm4, %v433_v48, 1326507024  ;;  %v444_v55 = vsel %vm436_vm5, %v427_v46, %v443_v53  ;;  %v438_v58 = vsel %vm434_vm3, %v418_v52, %v421_v44  ;;  %v440_v59 = vsel %vm436_vm5, %v424_v45, %v439_v49  ;;  %v1197_v46 = vld [vmem:[#allocation5 + $0x8] ss:$0 sm:$0xff]  ;;  %v1207_v52 = vld [vmem:[#allocation5 + $0xa] ss:$0 sm:$0xff] }
 0x145   :  { %v448_v56 = vsel %vm436_vm5, %v430_v47, %v447_v54  ;;  %v445_v60 = vsel %vm435_vm6, %v442_v50, %v444_v55  ;;  %v441_v4 = vsel %vm435_vm6, %v438_v58, %v440_v59  ;;  %v1202_v47 = vld [vmem:[#allocation5 + $0x9] ss:$0 sm:$0xff]  ;;  %v401_v55 = vmul.f32 %v1197_v46, %v2119_v15  ;;  %v1368_v46 = vld [vmem:[#allocation8 + $0xc8] sm:$0xff]  }
 0x146   :  { %v449_v61 = vsel %vm435_vm6, %v446_v51, %v448_v56  ;;  %v2128_v1 = vmul.u32.u64.low %v450_v57, %v445_v60  ;;  %v2129_v2 = vmul.u32.u64.high %v450_v57, %v445_v60, %v2128_v1  ;;  %v457_v6 = vmul.u32 %v450_v57, %v441_v4  ;;  %v1354_v60 = vld [vmem:[#allocation8 + $0x58] sm:$0xff]   ;;  %v1799_v4 = vld [vmem:[#allocation10 + $0x20] ss:$8 sps:$4 sm:$0xff]  }
 0x147   :  { %v2125_v62 = vmul.u32.u64.low %v450_v57, %v449_v61  ;;  %v2126_v63 = vmul.u32.u64.high %v450_v57, %v449_v61, %v2125_v62  ;;  %1595 = vmatpush3.bf16.msra.mxu0 %v1354_v60  ;;  %v1791_v61 = vld [vmem:[#allocation10 + $0x4] ss:$8 sps:$4 sm:$0xff]   ;;  %vm700_vm3 = vcmask 523264  }
 0x148   :  { %v460_v5 = vadd.s32 1, %v2129_v2  ;;  %1596 = vmatprep.subr.bf16.mxu0 %v1994_v3  ;;  %v1793_v62 = vld [vmem:[#allocation10] ss:$8 sps:$4 sm:$0xff]   ;;  %1609 = vmatprep.subr.bf16.mxu1 %v1791_v61  ;;  %v1211_v60 = vld [vmem:[#allocation5 + $0xf] ss:$0 sm:$0xff] }
 0x149   :  { %vm459_vm7 = vc.u32 %v2126_v63, %v2128_v1  ;;  %v458_v19 = vadd.s32 %v2128_v1, %v2126_v63  ;;  %v1794_v63 = vld [vmem:[#allocation10 + $0x14] ss:$8 sps:$4 sm:$0xff]   ;;  %v1796_v1 = vld [vmem:[#allocation10 + $0x10] ss:$8 sps:$4 sm:$0xff]  }
 0x14a   :  { %v461_v7 = vsel %vm459_vm7, %v460_v5, %v2129_v2  ;;  %v1797_v2 = vld [vmem:[#allocation10 + $0x24] ss:$8 sps:$4 sm:$0xff]  }
 0x14b   :  { %v462_v8 = vadd.s32 %v461_v7, %v457_v6  ;;  %v1800_v6 = vld [vmem:[#allocation10 + $0x34] ss:$8 sps:$4 sm:$0xff]  }
 0x14d   :  { %v463_v9 = vadd.s32 536870912, %v462_v8 }
 0x14f   :  { %v464_v10 = vshrl.u32 %v463_v9, 30 }
 0x151   :  { %v465_v11 = vshll.u32 %v464_v10, 30  ;;  %v488_v32 = vsub.s32 4, %v464_v10 }
 0x153   :  { %v466_v12 = vsub.s32 %v462_v8, %v465_v11  ;;  %v489_v35 = vsel %vm404_vm9, %v488_v32, %v464_v10  ;;  %v1355_v10 = vld [vmem:[#allocation8 + $0x60] sm:$0xff]   ;;  %v1802_v11 = vld [vmem:[#allocation10 + $0x30] ss:$8 sps:$4 sm:$0xff]  }
 0x154   :  { %v491_v37 = vsel %vm403_vm10, 0, %v489_v35  ;;  %v1826_v32 = vld [vmem:[#allocation10 + $0xb0] ss:$8 sps:$4 sm:$0xff]   ;;  %v1830_v35 = vld [vmem:[#allocation10 + $0xd4] ss:$8 sps:$4 sm:$0xff]  }
 0x155   :  { %v468_v13 = vsub.s32 0, %v466_v12  ;;  %v495_v38 = vadd.s32 3, %v491_v37  ;;  %v605_v40 = vand.u32 3, %v491_v37  ;;  %v1833_v37 = vld [vmem:[#allocation10 + $0xe4] ss:$8 sps:$4 sm:$0xff]  }
 0x157   :  { %v1199_v14 = vmin.u32 %v468_v13, %v466_v12  ;;  %v496_v39 = vand.u32 3, %v495_v38  ;;  %vm610_vm12 = vcmp.eq.s32.totalorder %v605_v40, 2  ;;  %vm607_vm14 = vcmp.eq.s32.totalorder %v605_v40, 0  ;;  %v1356_v13 = vld [vmem:[#allocation8 + $0x68] sm:$0xff]   ;;  %v1836_v38 = vld [vmem:[#allocation10 + $0xf4] ss:$8 sps:$4 sm:$0xff]  }
 0x158   :  { %vm606_vm1 = vcmp.lt.s32.totalorder %v605_v40, 2  ;;  %v1367_v40 = vld [vmem:[#allocation8 + $0xc0] sm:$0xff]  }
 0x159   :  { %v470_v16 = vclz %v1199_v14  ;;  %vm501_vm11 = vcmp.eq.s32.totalorder %v496_v39, 2  ;;  %vm498_vm13 = vcmp.eq.s32.totalorder %v496_v39, 0  ;;  %vm497_vm15 = vcmp.lt.s32.totalorder %v496_v39, 2  ;;  %v1805_v14 = vld [vmem:[#allocation10 + $0x40] ss:$8 sps:$4 sm:$0xff]  }
 0x15a   :  { %v1838_v39 = vld [vmem:[#allocation10 + $0xf0] ss:$8 sps:$4 sm:$0xff]  }
 0x15b   :  { %v1200_v17 = vadd.s32 4294967294, %v470_v16  ;;  %v1806_v16 = vld [vmem:[#allocation10 + $0x54] ss:$8 sps:$4 sm:$0xff]  }
 0x15d   :  { %vm1201_vm8 = vcmp.lt.s32.totalorder %v1200_v17, 0 }
 0x15e   :  { %v473_v18 = vsel %vm1201_vm8, 0, %v1200_v17  ;;  %v1357_v17 = vld [vmem:[#allocation8 + $0x70] sm:$0xff]  }
 0x15f   :  { %v474_v20 = vsub.s32 32, %v473_v18  ;;  %v478_v22 = vsub.s32 4294967266, %v473_v18  ;;  %v475_v23 = vshll.u32 %v466_v12, %v473_v18  ;;  %v1803_v12 = vld [vmem:[#allocation10 + $0x44] ss:$8 sps:$4 sm:$0xff]   ;;  %v1808_v18 = vld [vmem:[#allocation10 + $0x50] ss:$8 sps:$4 sm:$0xff]  }
 0x161   :  { %v476_v24 = vshrl.u32 %v458_v19, %v474_v20  ;;  %v479_v25 = vadd.s32 127, %v478_v22  ;;  %v1809_v19 = vld [vmem:[#allocation10 + $0x64] ss:$8 sps:$4 sm:$0xff]   ;;  %v1358_v20 = vld [vmem:[#allocation8 + $0x78] sm:$0xff]   ;;  %v1811_v22 = vld [vmem:[#allocation10 + $0x60] ss:$8 sps:$4 sm:$0xff]  }
 0x163   :  { %v477_v26 = vor.u32 %v476_v24, %v475_v23  ;;  %v480_v27 = vshll.u32 %v479_v25, 23  ;;  %v1812_v23 = vld [vmem:[#allocation10 + $0x74] ss:$8 sps:$4 sm:$0xff]   ;;  %v1814_v24 = vld [vmem:[#allocation10 + $0x70] ss:$8 sps:$4 sm:$0xff]  }
 0x164   :  { %v1815_v25 = vld [vmem:[#allocation10 + $0x84] ss:$8 sps:$4 sm:$0xff]  }
 0x165   :  { %v481_v28 = vor.u32 4788187, %v480_v27  ;;  %v484_v30 = vcvt.s32.f32 %v477_v26  ;;  %v1817_v26 = vld [vmem:[#allocation10 + $0x80] ss:$8 sps:$4 sm:$0xff]   ;;  %v1818_v27 = vld [vmem:[#allocation10 + $0x94] ss:$8 sps:$4 sm:$0xff]  }
 0x167   :  { %v482_v29 = vand.u32 2147483647, %v481_v28 }
 0x169   :  { %v485_v31 = vmul.f32 %v484_v30, %v482_v29  ;;  %v1820_v29 = vld [vmem:[#allocation10 + $0x90] ss:$8 sps:$4 sm:$0xff]   ;;  %v1823_v30 = vld [vmem:[#allocation10 + $0xa0] ss:$8 sps:$4 sm:$0xff]  }
 0x16b   :  { %v486_v33 = vxor.u32 2147483648, %v485_v31 }
 0x16d   :  { %v487_v34 = vsel %vm404_vm9, %v486_v33, %v485_v31  ;;  %v1824_v31 = vld [vmem:[#allocation10 + $0xb4] ss:$8 sps:$4 sm:$0xff]   ;;  %v1827_v33 = vld [vmem:[#allocation10 + $0xc4] ss:$8 sps:$4 sm:$0xff]  }
 0x16e   :  { %v490_v36 = vsel %vm403_vm10, %v2119_v15, %v487_v34  ;;  %v1208_v15 = vld [vmem:[#allocation5 + $0xd] ss:$0 sm:$0xff]  ;;  %v1829_v34 = vld [vmem:[#allocation10 + $0xc0] ss:$8 sps:$4 sm:$0xff]  }
 0x16f   :  { %1839 = vcosq.f32 %v490_v36 }
 0x170   :  { %1841 = vsinq.f32 %v490_v36  ;;  %v1832_v36 = vld [vmem:[#allocation10 + $0xd0] ss:$8 sps:$4 sm:$0xff]  }
 0x179   :  { %v1840_v41 = vpop.eup %1839 }
 0x17a   :  { %v1842_v42 = vpop.eup %1841  ;;  %v502_v43 = vxor.u32 2147483648, %v1840_v41 }
 0x17b   :  { %v499_v44 = vxor.u32 2147483648, %v1842_v42 }
 0x17c   :  { %v503_v45 = vsel %vm501_vm11, %v502_v43, %v1842_v42  ;;  %v612_v21 = vsel %vm610_vm12, %v502_v43, %v1842_v42 }
 0x17d   :  { %v500_v48 = vsel %vm498_vm13, %v1840_v41, %v499_v44  ;;  %v609_v49 = vsel %vm607_vm14, %v1840_v41, %v499_v44  ;;  %v1209_v41 = vld [vmem:[#allocation5 + $0xe] ss:$0 sm:$0xff] }
 0x17e   :  { %v504_v50 = vsel %vm497_vm15, %v500_v48, %v503_v45  ;;  %v613_v51 = vsel %vm606_vm1, %v609_v49, %v612_v21  ;;  %v1359_v21 = vld [vmem:[#allocation8 + $0x80] sm:$0xff]   ;;  %v1369_v48 = vld [vmem:[#allocation8 + $0xd0] sm:$0xff]  }
 0x17f   :  { %v505_v53 = vsel %vm494_vm2, nan, %v504_v50  ;;  %v614_v54 = vsel %vm494_vm2, nan, %v613_v51  ;;  %v1361_v49 = vld [vmem:[#allocation8 + $0x90] sm:$0xff]   ;;  %v1370_v50 = vld [vmem:[#allocation8 + $0xd8] sm:$0xff]  }
 0x180   :  { %v510_v56 = vmul.f32 %v1202_v47, %v505_v53  ;;  %v619_v58 = vmul.f32 %v1207_v52, %v614_v54  ;;  %v1360_v47 = vld [vmem:[#allocation8 + $0x88] sm:$0xff]   ;;  %v1362_v51 = vld [vmem:[#allocation8 + $0x98] sm:$0xff]   ;;  %v1371_v52 = vld [vmem:[#allocation8 + $0xe0] sm:$0xff]  }
 0x181   :  { %v1363_v53 = vld [vmem:[#allocation8 + $0xa0] sm:$0xff]   ;;  %v1372_v54 = vld [vmem:[#allocation8 + $0xe8] sm:$0xff]  }
 0x182   :  { %v511_v57 = vadd.f32 %v510_v56, %v401_v55  ;;  %v1364_v55 = vld [vmem:[#allocation8 + $0xa8] sm:$0xff]   ;;  %v1373_v56 = vld [vmem:[#allocation8 + $0xf0] sm:$0xff]  }
 0x184   :  { %v620_v59 = vadd.f32 %v619_v58, %v511_v57  ;;  %v1365_v57 = vld [vmem:[#allocation8 + $0xb0] sm:$0xff]   ;;  %v1374_v58 = vld [vmem:[#allocation8 + $0xf8] sm:$0xff]  }
 0x186   :  { %1520 = vmatmul.mubr.f32.vlgmr.msra.gmra.mrb[0].mxu1 %v620_v59  ;;  %v1366_v59 = vld [vmem:[#allocation8 + $0xb8] sm:$0xff]  }
 0x187   :  { %929 = vmatprep.mubr.f32.mxu1 %v1992_v0  ;;  %1611 = vmatpush1.bf16.msra.mxu1 %v1793_v62 }
 0x188   :  { %1613 = vmatprep.subr.bf16.mxu1 %v1794_v63 }
 0x18b   :  { %1615 = vmatpush1.bf16.msra.mxu1 %v1796_v1 }
 0x18c   :  { %1617 = vmatprep.subr.bf16.mxu1 %v1797_v2  ;;  %v855_v2 = vlaneseq }
 0x18f   :  { %1619 = vmatpush1.bf16.msra.mxu1 %v1799_v4 }
 0x190   :  { %1621 = vmatprep.subr.bf16.mxu1 %v1800_v6 }
 0x193   :  { %1623 = vmatpush1.bf16.msra.mxu1 %v1802_v11 }
 0x194   :  { %1625 = vmatprep.subr.bf16.mxu1 %v1803_v12 }
 0x197   :  { %1627 = vmatpush1.bf16.msra.mxu1 %v1805_v14 }
 0x198   :  { %1629 = vmatprep.subr.bf16.mxu1 %v1806_v16  ;;  %v98_v16 = vld [vmem:[#allocation7 + $0x1] ss:$8 sm:$0x3] }
 0x19b   :  { %1631 = vmatpush1.bf16.msra.mxu1 %v1808_v18 }
 0x19c   :  { %1633 = vmatprep.subr.bf16.mxu1 %v1809_v19 }
 0x19f   :  { %1635 = vmatpush1.bf16.msra.mxu1 %v1811_v22 }
 0x1a0   :  { %1637 = vmatprep.subr.bf16.mxu1 %v1812_v23 }
 0x1a3   :  { %1639 = vmatpush1.bf16.msra.mxu1 %v1814_v24 }
 0x1a4   :  { %1673 = vmatprep.subr.bf16.mxu1 %v1367_v40 }
 0x259   :  { %v691_v5 = vpop.f32.mrb[0].mxu1 }
 0x25a   :  { %v692_v7 = vadd.f32 %v1208_v15, %v691_v5  ;;  %v1521_v8 = vpop.f32.mrb[1].mxu1  ;;  %v856_v15 = vshrl.u32 %v855_v2, 7  ;;  %v96_v5 = vld [vmem:[#allocation7] ss:$8 sm:$0x3] }
 0x25c   :  { %v695_v9 = vmax.f32 %v692_v7, 0.0  ;;  %v857_v4 = vsub.s32 0, %v856_v15  ;;  %v861_v6 = vsub.s32 1, %v856_v15 }
 0x25e   :  { %1539 = vmatmul.mubr.msk.f32.vlgmr.msra.gmra.mrb[2].mxu0 %vm700_vm3, %v695_v9  ;;  %779 = vrot.lane.b32.xlu0 %v695_v9, %s1987_s1  ;;  %v858_v7 = vrot.slane %v96_v5, %v857_v4  ;;  %v862_v8 = vrot.slane %v96_v5, %v861_v6  ;;  %v946_v18 = vrot.slane %v98_v16, %v861_v6 }
 0x25f   :  { %1598 = vmatpush3.bf16.msra.mxu0 %v1355_v10  ;;  %1557 = vmatprep.mubr.msk.f32.mxu0 %vm1993_vm0, %v1992_v0 }
 0x260   :  { %1599 = vmatprep.subr.bf16.mxu0 %v1994_v3 }
 0x263   :  { %1601 = vmatpush3.bf16.msra.mxu0 %v1356_v13 }
 0x264   :  { %1602 = vmatprep.subr.bf16.mxu0 %v1994_v3 }
 0x267   :  { %1604 = vmatpush3.bf16.msra.mxu0 %v1357_v17  ;;  %v942_v17 = vrot.slane %v98_v16, %v857_v4 }
 0x268   :  { %1605 = vmatprep.subr.bf16.mxu0 %v1994_v3  ;;  %v1821_v3 = vld [vmem:[#allocation10 + $0xa4] ss:$8 sps:$4 sm:$0xff]  }
 0x26b   :  { %1607 = vmatpush3.bf16.msra.mxu0 %v1358_v20 }
 0x26c   :  { %1641 = vmatprep.subr.bf16.mxu0 %v1815_v25 }
 0x2d0   :  { %v780_v28 = vpop.permute.xlu0 %779 }
 0x2d1   :  { %1558 = vmatmul.mubr.msk.f32.vlgmr.msra.gmra.mrb[4].mxu0 %vm700_vm3, %v780_v28 }
 0x2d2   :  { %1643 = vmatpush1.bf16.msra.mxu0 %v1817_v26  ;;  %1013 = vmatprep.mubr.f32.mxu0 %v1992_v0  ;;  %v1835_v0 = vld [vmem:[#allocation10 + $0xe0] ss:$8 sps:$4 sm:$0xff]  }
 0x2d3   :  { %1645 = vmatprep.subr.bf16.mxu0 %v1818_v27 }
 0x2d6   :  { %1647 = vmatpush1.bf16.msra.mxu0 %v1820_v29 }
 0x2d7   :  { %1649 = vmatprep.subr.bf16.mxu0 %v1821_v3  ;;  %v1213_v3 = vld [vmem:[#allocation5 + $0xb] ss:$0 sm:$0xff] }
 0x2da   :  { %1651 = vmatpush1.bf16.msra.mxu0 %v1823_v30  ;;  %v1214_v30 = vld [vmem:[#allocation5 + $0xc] ss:$0 sm:$0xff] }
 0x2db   :  { %1653 = vmatprep.subr.bf16.mxu0 %v1824_v31 }
 0x2de   :  { %1655 = vmatpush1.bf16.msra.mxu0 %v1826_v32 }
 0x2df   :  { %1657 = vmatprep.subr.bf16.mxu0 %v1827_v33 }
 0x2e2   :  { %1659 = vmatpush1.bf16.msra.mxu0 %v1829_v34 }
 0x2e3   :  { %1661 = vmatprep.subr.bf16.mxu0 %v1830_v35  ;;  %v1215_v35 = vld [vmem:[#allocation5 + $0x10] ss:$0 sm:$0xff] }
 0x2e6   :  { %1663 = vmatpush1.bf16.msra.mxu0 %v1832_v36 }
 0x2e7   :  { %1665 = vmatprep.subr.bf16.mxu0 %v1833_v37 }
 0x2ea   :  { %1667 = vmatpush1.bf16.msra.mxu0 %v1835_v0 }
 0x2eb   :  { %1669 = vmatprep.subr.bf16.mxu0 %v1836_v38 }
 0x2ee   :  { %1671 = vmatpush1.bf16.msra.mxu0 %v1838_v39 }
 0x2ef   :  { %1705 = vmatprep.subr.bf16.mxu0 %v1367_v40 }
 0x331   :  { %v770_v42 = vpop.f32.mrb[2].mxu0 }
 0x332   :  { %v771_v43 = vadd.f32 %v1209_v41, %v770_v42  ;;  %v1540_v44 = vpop.f32.mrb[3].mxu0 }
 0x334   :  { %v774_v45 = vmax.f32 %v771_v43, 0.0 }
 0x336   :  { %930 = vmatmul.mubr.f32.vlgmr.msra.gmra.mrb[2].mxu1 %v774_v45 }
 0x337   :  { %1675 = vmatpush3.bf16.msra.mxu1 %v1359_v21 }
 0x338   :  { %1677 = vmatprep.subr.bf16.mxu1 %v1368_v46 }
 0x33b   :  { %1679 = vmatpush3.bf16.msra.mxu1 %v1360_v47 }
 0x33c   :  { %1681 = vmatprep.subr.bf16.mxu1 %v1369_v48 }
 0x33f   :  { %1683 = vmatpush3.bf16.msra.mxu1 %v1361_v49 }
 0x340   :  { %1685 = vmatprep.subr.bf16.mxu1 %v1370_v50 }
 0x343   :  { %1687 = vmatpush3.bf16.msra.mxu1 %v1362_v51 }
 0x344   :  { %1689 = vmatprep.subr.bf16.mxu1 %v1371_v52 }
 0x347   :  { %1691 = vmatpush3.bf16.msra.mxu1 %v1363_v53 }
 0x348   :  { %1693 = vmatprep.subr.bf16.mxu1 %v1372_v54 }
 0x34b   :  { %1695 = vmatpush3.bf16.msra.mxu1 %v1364_v55 }
 0x34c   :  { %1697 = vmatprep.subr.bf16.mxu1 %v1373_v56 }
 0x34f   :  { %1699 = vmatpush3.bf16.msra.mxu1 %v1365_v57 }
 0x350   :  { %1701 = vmatprep.subr.bf16.mxu1 %v1374_v58 }
 0x353   :  { %1703 = vmatpush3.bf16.msra.mxu1 %v1366_v59 }
 0x3a4   :  { %v849_v61 = vpop.f32.mrb[4].mxu0 }
 0x3a5   :  { %v850_v62 = vadd.f32 %v1211_v60, %v849_v61  ;;  %v1559_v63 = vpop.f32.mrb[5].mxu0 }
 0x3a7   :  { %v853_v1 = vmax.f32 %v850_v62, 0.0 }
 0x3a9   :  { %1014 = vmatmul.mubr.f32.vlgmr.msra.gmra.mrb[6].mxu0 %v853_v1 }
 0x3aa   :  { %1707 = vmatpush3.bf16.msra.mxu0 %v1359_v21 }
 0x3ab   :  { %1709 = vmatprep.subr.bf16.mxu0 %v1368_v46 }
 0x3ae   :  { %1711 = vmatpush3.bf16.msra.mxu0 %v1360_v47 }
 0x3af   :  { %1713 = vmatprep.subr.bf16.mxu0 %v1369_v48 }
 0x3b2   :  { %1715 = vmatpush3.bf16.msra.mxu0 %v1361_v49 }
 0x3b3   :  { %1717 = vmatprep.subr.bf16.mxu0 %v1370_v50 }
 0x3b6   :  { %1719 = vmatpush3.bf16.msra.mxu0 %v1362_v51 }
 0x3b7   :  { %1721 = vmatprep.subr.bf16.mxu0 %v1371_v52 }
 0x3ba   :  { %1723 = vmatpush3.bf16.msra.mxu0 %v1363_v53 }
 0x3bb   :  { %1725 = vmatprep.subr.bf16.mxu0 %v1372_v54 }
 0x3be   :  { %1727 = vmatpush3.bf16.msra.mxu0 %v1364_v55 }
 0x3bf   :  { %1729 = vmatprep.subr.bf16.mxu0 %v1373_v56 }
 0x3c2   :  { %1731 = vmatpush3.bf16.msra.mxu0 %v1365_v57 }
 0x3c3   :  { %1733 = vmatprep.subr.bf16.mxu0 %v1374_v58 }
 0x3c6   :  { %1735 = vmatpush3.bf16.msra.mxu0 %v1366_v59 }
 0x409   :  { %v931_v9 = vpop.f32.mrb[2].mxu1 }
 0x40a   :  { %v932_v10 = vadd.f32 %v931_v9, %v858_v7  ;;  %v933_v11 = vpop.f32.mrb[3].mxu1 }
 0x40b   :  { %v934_v12 = vadd.f32 %v933_v11, %v862_v8 }
 0x40c   :  { %v936_v14 = vmax.f32 %v932_v10, 0.0 }
 0x40d   :  { %v937_v13 = vmax.f32 %v934_v12, 0.0 }
 0x40f   :  { %1086 = vmatprep.mubr.f32.mxu1 %v937_v13 }
 0x410   :  { %1087 = vmatmul.mubr.f32.vlgmr.msra.gmra.mrb[4].mxu1 %v936_v14 }
 0x47c   :  { %v1015_v19 = vpop.f32.mrb[6].mxu0 }
 0x47d   :  { %v1016_v20 = vadd.f32 %v1015_v19, %v942_v17  ;;  %v1017_v22 = vpop.f32.mrb[7].mxu0 }
 0x47e   :  { %v1018_v23 = vadd.f32 %v1017_v22, %v946_v18 }
 0x47f   :  { %v1020_v25 = vmax.f32 %v1016_v20, 0.0 }
 0x480   :  { %v1021_v24 = vmax.f32 %v1018_v23, 0.0 }
 0x482   :  { %1161 = vmatprep.mubr.f32.mxu0 %v1021_v24 }
 0x483   :  { %1162 = vmatmul.mubr.f32.vlgmr.msra.gmra.mrb[8].mxu0 %v1020_v25 }
 0x4e3   :  { %v1444_v26 = vpop.f32.mrb[4].mxu1 }
 0x4e4   :  { %v1445_v27 = vpop.f32.mrb[5].mxu1 }
 0x4e5   :  { %v1446_v28 = vadd.f32 %v1445_v27, %v1444_v26 }
 0x4e7   :  { %v1096_v33 = vmul.f32 %v1446_v28, %v1213_v3 }
 0x556   :  { %v1479_v29 = vpop.f32.mrb[8].mxu0 }
 0x557   :  { %v1480_v31 = vpop.f32.mrb[9].mxu0 }
 0x558   :  { %v1481_v32 = vadd.f32 %v1480_v31, %v1479_v29 }
 0x55a   :  { %v1171_v34 = vmul.f32 %v1481_v32, %v1214_v30 }
 0x55c   :  { %v1172_v36 = vadd.f32 %v1171_v34, %v1096_v33 }
 0x55e   :  { %v1177_v37 = vadd.f32 %v1215_v35, %v1172_v36 }
 0x560   :  { %1178 = vst [vmem:[#allocation11] sm:$0xff] %v1177_v37 }
 0x561   :  { %1964 = shalt.err (!%p1961_p2)
}
 0x562   :  { %s1965_s3 = scalar_lea.hbm %s2169_s5, 128 }
 0x563   :  { %p1966_p3 = scmp.ne.s32.totalorder %s2169_s5, %s1965_s3  ;;  %p1969_p4 = scmp.lt.u32.totalorder %s1965_s3, %s2169_s5 }
 0x565   :  { %p1971_p5 = pnand %p1969_p4, %p1966_p3 }
 0x567   :  { %1974 = shalt.err (!%p1971_p5)
}
 0x568   :  { %1188 = dma.vmem_to_hbm [thread:$0]  %s1186_s28, 128, %s2169_s5, [#allocation4]  }
 0x569   :  { %1981 = dma.done.wait [#allocation4], 128  }
 0x56a   :  { %1982 = vsyncadd [#allocation4], 4294967168 }
 0x56b   :  { %1192 = vsyncpa [#allocation3], 1 }
 0x56c   :  { %1193 = vsyncpa [#allocation6], 1 }
 0x56d   :  { %1194 = vsyncpa [#allocation9], 1 }
 0x56e   :  { %1195 = vsyncpa [#allocation4], 1 }

</bundles_post_ra>
